<compile_context>
chip_gen: v5e
topology: v5e:2x2
jax: 0.10.0
libtpu: 0.0.40
codegen_flags: <defaults>
</compile_context>

<pallas_src>
import functools

import jax
import jax.numpy as jnp
from jax import lax
from jax.experimental import pallas as pl
from jax.experimental.pallas import tpu as pltpu

LANES = 128
SUBLANES = 8
ACC_ROWS = 64            # widened resident accumulator (8 independent vregs)
MAX_BLOCK_ROWS = 16384   # v5e/v6e ceiling; v7x is clamped lower by VMEM budget


def _cdiv(a, b):
    return -(-a // b)


def _round_up(a, m):
    return _cdiv(a, m) * m


def _vmem_capacity_bytes():
    try:
        info = pltpu.get_tpu_info()
        cap = getattr(info, "vmem_capacity_bytes", None)
        if cap:
            return int(cap)
    except Exception:
        pass
    return 64 * 1024 * 1024   # conservative default (v7x per-TensorCore VMEM)


def _focal_kernel(*refs, gamma, alpha, block_rows, acc_rows, steps_per_split,
                  rows_full, rem_lanes, has_pw, fast_pt, need_mask):
    if has_pw:
        x_ref, y_ref, pw_ref, out_ref = refs
    else:
        x_ref, y_ref, out_ref = refs
        pw_ref = None

    c = pl.program_id(0)   # split (parallel) axis
    i = pl.program_id(1)   # reduction (arbitrary) axis

    @pl.when(i == 0)
    def _():
        out_ref[...] = jnp.zeros_like(out_ref)

    x = x_ref[...].astype(jnp.float32)
    y = y_ref[...].astype(jnp.float32)

    # Numerically-stable BCEWithLogits (reduction='none'):
    #   bce = (1 - y) * x + log_weight * (log1p(exp(-|x|)) + max(-x, 0))
    s = jnp.exp(-jnp.abs(x))                          # EUP op #1
    softplus_term = jnp.log1p(s) + jnp.maximum(-x, 0.0)  # EUP op #2

    if has_pw:
        pw = pw_ref[...].astype(jnp.float32)
        log_weight = 1.0 + (pw - 1.0) * y
        bce = (1.0 - y) * x + log_weight * softplus_term
    else:
        bce = (1.0 - y) * x + softplus_term

    if fast_pt:
        # pt = exp(-bce) rewritten for binary targets: pt = sigmoid(x) if y==1
        # else sigmoid(-x) = where(sign-match, 1, s) / (1 + s).  Saves the
        # third EUP transcendental (binding slot on v7x / bf16 inputs).
        match = (x >= 0.0) == (y >= 0.5)
        pt = jnp.where(match, 1.0, s) / (1.0 + s)
    else:
        pt = jnp.exp(-bce)                            # exact (soft y / pos_weight)

    one_minus_pt = 1.0 - pt

    # Focal modulation: integer gamma -> repeated VPU multiply (no EUP pow).
    g_int = int(round(gamma))
    if abs(gamma - g_int) < 1e-12 and 0 <= g_int <= 8:
        if g_int == 0:
            focal = alpha * bce
        else:
            mod = one_minus_pt
            for _ in range(g_int - 1):
                mod = mod * one_minus_pt
            focal = alpha * mod * bce
    else:
        focal = alpha * jnp.power(one_minus_pt, gamma) * bce

    def accumulate(vals):
        # (block_rows, 128) -> (block_rows//acc_rows, acc_rows, 128); the
        # axis-0 sum is pure VPU adds into acc_rows/8 independent vreg chains.
        partial = vals.reshape(block_rows // acc_rows, acc_rows, LANES).sum(axis=0)
        out_ref[...] += partial[None, :, :]

    if need_mask:
        # Row-granular mask math (no int32 overflow even for huge tensors).
        row0 = (c * steps_per_split + i) * block_rows

        @pl.when(row0 + block_rows <= rows_full)
        def _():
            accumulate(focal)

        @pl.when(row0 + block_rows > rows_full)
        def _():
            row_g = row0 + lax.broadcasted_iota(jnp.int32, (block_rows, LANES), 0)
            valid = row_g < rows_full
            if rem_lanes:
                lane = lax.broadcasted_iota(jnp.int32, (block_rows, LANES), 1)
                valid = valid | ((row_g == rows_full) & (lane < rem_lanes))
            accumulate(jnp.where(valid, focal, 0.0))
    else:
        accumulate(focal)


def bce_focal_loss_with_logits(inputs, targets, gamma=2.0, alpha=0.25,
                               class_weights=None, reduction='mean',
                               binary_targets=True,
                               max_block_rows=MAX_BLOCK_ROWS):
    """Matches BCEFocalLossWithLogits(...).forward(inputs, targets).

    binary_targets=True enables the 2-transcendental pt path (exact when
    targets are in {0,1}); pass False for soft labels to reproduce exp(-bce).
    """
    assert inputs.shape == targets.shape
    if reduction == 'none':
        # TODO(synk): elementwise (no-reduction) output path not implemented.
        raise NotImplementedError("reduction='none' not implemented")
    if reduction not in ('mean', 'sum'):
        raise NotImplementedError(f'Invalid reduction mode: {reduction}')

    n_valid = int(inputs.size)
    has_pw = class_weights is not None
    fast_pt = bool(binary_targets) and not has_pw

    rows_needed = _cdiv(n_valid, LANES)
    rows_full = n_valid // LANES
    rem_lanes = n_valid % LANES

    operands = [inputs, targets]
    if has_pw:
        # TODO(synk): pos_weight is still materialized as a full third HBM
        # stream; an untiled SMEM weight table would halve weighted-path traffic.
        operands.append(jnp.broadcast_to(
            jnp.asarray(class_weights, jnp.float32), inputs.shape))

    itemsize_sum = sum(op.dtype.itemsize for op in operands)

    # Generation-aware tile size: largest lane-dense tile whose double-buffered
    # input DMAs fit in ~1/4 of this chip's VMEM.
    vmem_cap = _vmem_capacity_bytes()
    rows_by_vmem = max((vmem_cap // 4) // (2 * LANES * max(itemsize_sum, 1)),
                       SUBLANES)
    block_rows = min(int(max_block_rows), rows_by_vmem,
                     _round_up(rows_needed, SUBLANES))
    if block_rows >= ACC_ROWS:
        block_rows = _round_up(block_rows, ACC_ROWS)
        acc_rows = ACC_ROWS
    else:
        block_rows = _round_up(block_rows, SUBLANES)
        acc_rows = SUBLANES

    steps_total = _cdiv(rows_needed, block_rows)
    n_splits = 2 if steps_total >= 2 else 1         # v7x megacore split
    steps_per_split = _cdiv(steps_total, n_splits)
    grid_steps = n_splits * steps_per_split
    need_mask = (grid_steps * block_rows * LANES) != n_valid

    # No wrapper-side padding unless the flat size is not 128-aligned; Pallas
    # partial boundary blocks + the in-kernel mask cover everything else.
    def prep(a):
        flat = a.reshape(-1)
        if rem_lanes:
            # TODO(synk): this <128-element pad still costs a full-array copy;
            # handling the sub-lane tail outside the kernel would remove it.
            flat = jnp.pad(flat, (0, LANES - rem_lanes))
        return flat.reshape(rows_needed, LANES)

    operands = [prep(op) for op in operands]

    kernel = functools.partial(
        _focal_kernel,
        gamma=float(gamma), alpha=float(alpha),
        block_rows=block_rows, acc_rows=acc_rows,
        steps_per_split=steps_per_split,
        rows_full=rows_full, rem_lanes=rem_lanes,
        has_pw=has_pw, fast_pt=fast_pt, need_mask=need_mask)

    last_block = steps_total - 1

    def in_index_map(c, i):
        blk = c * steps_per_split + i
        # Wasted trailing steps (odd step counts under the 2-way split) re-read
        # the last block; their contribution is fully masked in the kernel.
        return (jnp.minimum(blk, last_block), 0)

    tile_spec = pl.BlockSpec((block_rows, LANES), in_index_map)
    in_specs = [tile_spec] * len(operands)

    vmem_needed = 2 * block_rows * LANES * itemsize_sum + 4 * acc_rows * LANES * 4
    vmem_limit = int(min(max(vmem_needed + (8 << 20), 32 << 20),
                         (vmem_cap * 3) // 4))

    partials = pl.pallas_call(
        kernel,
        out_shape=jax.ShapeDtypeStruct((n_splits, acc_rows, LANES), jnp.float32),
        grid_spec=pltpu.PrefetchScalarGridSpec(
            num_scalar_prefetch=0,
            grid=(n_splits, steps_per_split),
            in_specs=in_specs,
            out_specs=pl.BlockSpec((1, acc_rows, LANES), lambda c, i: (c, 0, 0)),
        ),
        compiler_params=pltpu.CompilerParams(
            dimension_semantics=("parallel", "arbitrary"),
            vmem_limit_bytes=vmem_limit),
    )(*operands)

    total = jnp.sum(partials)
    if reduction == 'mean':
        return total / jnp.float32(n_valid)
    return total  # 'sum'


def _reference(inputs, targets, gamma=2.0, alpha=0.25, reduction='mean',
               pos_weight=None):
    x = inputs.astype(jnp.float32)
    y = targets.astype(jnp.float32)
    sp = jnp.log1p(jnp.exp(-jnp.abs(x))) + jnp.maximum(-x, 0.0)
    if pos_weight is not None:
        pw = jnp.broadcast_to(jnp.asarray(pos_weight, jnp.float32), x.shape)
        bce = (1.0 - y) * x + (1.0 + (pw - 1.0) * y) * sp
    else:
        bce = (1.0 - y) * x + sp
    pt = jnp.exp(-bce)
    focal = alpha * (1.0 - pt) ** gamma * bce
    return jnp.mean(focal) if reduction == 'mean' else jnp.sum(focal)


if __name__ == "__main__":
    key = jax.random.PRNGKey(0)
    k_x, k_y, k_x2, k_y2, k_x3, k_y3 = jax.random.split(key, 6)

    # Case 1: NCHW logits/targets, 128-aligned -> zero-copy clean path.
    shape = (2, 4, 16, 16)
    inputs = jax.random.normal(k_x, shape, dtype=jnp.float32) * 2.0
    targets = jax.random.bernoulli(k_y, p=0.3, shape=shape).astype(jnp.float32)
    loss = jax.block_until_ready(
        bce_focal_loss_with_logits(inputs, targets, gamma=2.0, alpha=0.25))
    ref = jax.block_until_ready(_reference(inputs, targets))
    assert jnp.allclose(loss, ref, atol=1e-6, rtol=1e-5), (loss, ref)

    # Case 1b: exact exp(-bce) path (soft-target fallback) on the same data.
    loss_b = jax.block_until_ready(
        bce_focal_loss_with_logits(inputs, targets, binary_targets=False))
    assert jnp.allclose(loss_b, ref, atol=1e-6, rtol=1e-5), (loss_b, ref)

    # Case 1c: bf16 inputs/targets (narrow HBM stream, in-kernel f32 math).
    loss_bf = jax.block_until_ready(
        bce_focal_loss_with_logits(inputs.astype(jnp.bfloat16),
                                   targets.astype(jnp.bfloat16)))
    ref_bf = jax.block_until_ready(
        _reference(inputs.astype(jnp.bfloat16), targets.astype(jnp.bfloat16)))
    assert jnp.allclose(loss_bf, ref_bf, atol=1e-5, rtol=1e-4), (loss_bf, ref_bf)

    # Case 1d: class_weights (pos_weight) path + 'sum' reduction.
    cw = jnp.array([0.5, 1.0, 2.0, 4.0], jnp.float32).reshape(4, 1, 1)
    loss_w = jax.block_until_ready(
        bce_focal_loss_with_logits(inputs, targets, class_weights=cw,
                                   reduction='sum'))
    ref_w = jax.block_until_ready(
        _reference(inputs, targets, pos_weight=cw, reduction='sum'))
    assert jnp.allclose(loss_w, ref_w, atol=1e-4, rtol=1e-5), (loss_w, ref_w)

    # Case 2: ragged size -> sub-128 tail pad + in-kernel row/lane mask.
    shape2 = (3, 5, 17, 13)
    inputs2 = jax.random.normal(k_x2, shape2, dtype=jnp.float32) * 2.0
    targets2 = jax.random.bernoulli(k_y2, p=0.4, shape=shape2).astype(jnp.float32)
    loss2 = jax.block_until_ready(bce_focal_loss_with_logits(inputs2, targets2))
    ref2 = jax.block_until_ready(_reference(inputs2, targets2))
    assert jnp.allclose(loss2, ref2, atol=1e-6, rtol=1e-5), (loss2, ref2)

    # Case 3: force multi-step grid + 2-way split + mask with tiny tiles.
    loss3 = jax.block_until_ready(
        bce_focal_loss_with_logits(inputs2, targets2, max_block_rows=8))
    assert jnp.allclose(loss3, ref2, atol=1e-6, rtol=1e-5), (loss3, ref2)

    # Case 4: 128-aligned but odd number of blocks -> clamped/wasted grid step.
    shape3 = (3, 8, 128)
    inputs3 = jax.random.normal(k_x3, shape3, dtype=jnp.float32) * 2.0
    targets3 = jax.random.bernoulli(k_y3, p=0.5, shape=shape3).astype(jnp.float32)
    loss4 = jax.block_until_ready(
        bce_focal_loss_with_logits(inputs3, targets3, max_block_rows=8))
    ref4 = jax.block_until_ready(_reference(inputs3, targets3))
    assert jnp.allclose(loss4, ref4, atol=1e-6, rtol=1e-5), (loss4, ref4)

    print("KERNEL_OK")
</pallas_src>

<mosaic_0001>
module attributes {stable_mosaic.version = 11 : i64} {
  func.func @_focal_kernel(%arg0: i32, %arg1: i32, %arg2: memref<16x128xf32, #tpu.memory_space<vmem>>, %arg3: memref<16x128xf32, #tpu.memory_space<vmem>>, %arg4: memref<1x8x128xf32, #tpu.memory_space<vmem>>) attributes {dimension_semantics = [#tpu.dimension_semantics<parallel>, #tpu.dimension_semantics<arbitrary>], iteration_bounds = array<i64: 1, 1>, scalar_prefetch = 0 : i64, scratch_operands = 0 : i64, tpu.core_type = #tpu.core_type<tc>, window_params = [{transform_indices = @transform_0, window_bounds = array<i64: 16, 128>}, {transform_indices = @transform_1, window_bounds = array<i64: 16, 128>}, {transform_indices = @transform_2, window_bounds = array<i64: 1, 8, 128>}]} {
    %c0_i32 = arith.constant 0 : i32
    %0 = arith.cmpi eq, %arg1, %c0_i32 : i32
    %1 = arith.extui %0 : i1 to i32
    %c0_i32_0 = arith.constant 0 : i32
    %2 = arith.cmpi ne, %1, %c0_i32_0 : i32
    scf.if %2 {
      %cst_21 = arith.constant 0.000000e+00 : f32
      %42 = vector.broadcast %cst_21 : f32 to vector<1x8x128xf32>
      %c0_22 = arith.constant 0 : index
      %c0_23 = arith.constant 0 : index
      %c0_24 = arith.constant 0 : index
      %43 = vector.load %arg4[%c0_22, %c0_23, %c0_24] : memref<1x8x128xf32, #tpu.memory_space<vmem>>, vector<1x8x128xf32>
      tpu.vector_store %arg4[%c0_22, %c0_23, %c0_24], %42 {strides = array<i32>} : memref<1x8x128xf32, #tpu.memory_space<vmem>>, vector<1x8x128xf32>,
    } else {
    }
    %c0 = arith.constant 0 : index
    %c0_1 = arith.constant 0 : index
    %3 = vector.load %arg2[%c0, %c0_1] : memref<16x128xf32, #tpu.memory_space<vmem>>, vector<16x128xf32>
    %c0_2 = arith.constant 0 : index
    %c0_3 = arith.constant 0 : index
    %4 = vector.load %arg3[%c0_2, %c0_3] : memref<16x128xf32, #tpu.memory_space<vmem>>, vector<16x128xf32>
    %5 = math.absf %3 : vector<16x128xf32>
    %cst = arith.constant 0.000000e+00 : f32
    %6 = vector.broadcast %cst : f32 to vector<16x128xf32>
    %7 = arith.subf %6, %5 : vector<16x128xf32>
    %8 = math.exp %7 : vector<16x128xf32>
    %9 = math.log1p %8 : vector<16x128xf32>
    %cst_4 = arith.constant 0.000000e+00 : f32
    %10 = vector.broadcast %cst_4 : f32 to vector<16x128xf32>
    %11 = arith.subf %10, %3 : vector<16x128xf32>
    %cst_5 = arith.constant 0.000000e+00 : f32
    %12 = vector.broadcast %cst_5 : f32 to vector<16x128xf32>
    %13 = arith.maximumf %11, %12 : vector<16x128xf32>
    %14 = arith.addf %9, %13 : vector<16x128xf32>
    %cst_6 = arith.constant 1.000000e+00 : f32
    %15 = vector.broadcast %cst_6 : f32 to vector<16x128xf32>
    %16 = arith.subf %15, %4 : vector<16x128xf32>
    %17 = arith.mulf %16, %3 : vector<16x128xf32>
    %18 = arith.addf %17, %14 : vector<16x128xf32>
    %cst_7 = arith.constant 0.000000e+00 : f32
    %19 = vector.broadcast %cst_7 : f32 to vector<16x128xf32>
    %20 = arith.cmpf oge, %3, %19 : vector<16x128xf32>
    %cst_8 = arith.constant 5.000000e-01 : f32
    %21 = vector.broadcast %cst_8 : f32 to vector<16x128xf32>
    %22 = arith.cmpf oge, %4, %21 : vector<16x128xf32>
    %23 = arith.xori %20, %22 : vector<16x128xi1>
    %cst_9 = arith.constant dense<true> : vector<16x128xi1>
    %24 = arith.xori %23, %cst_9 : vector<16x128xi1>
    %cst_10 = arith.constant 1.000000e+00 : f32
    %25 = vector.broadcast %cst_10 : f32 to vector<16x128xf32>
    %26 = arith.select %24, %25, %8 : vector<16x128xi1>, vector<16x128xf32>
    %cst_11 = arith.constant 1.000000e+00 : f32
    %27 = vector.broadcast %cst_11 : f32 to vector<16x128xf32>
    %28 = arith.addf %27, %8 : vector<16x128xf32>
    %29 = arith.divf %26, %28 : vector<16x128xf32>
    %cst_12 = arith.constant 1.000000e+00 : f32
    %30 = vector.broadcast %cst_12 : f32 to vector<16x128xf32>
    %31 = arith.subf %30, %29 : vector<16x128xf32>
    %32 = arith.mulf %31, %31 : vector<16x128xf32>
    %cst_13 = arith.constant 2.500000e-01 : f32
    %33 = vector.broadcast %cst_13 : f32 to vector<16x128xf32>
    %34 = arith.mulf %33, %32 : vector<16x128xf32>
    %35 = arith.mulf %34, %18 : vector<16x128xf32>
    %36 = vector.shape_cast %35 : vector<16x128xf32> to vector<2x8x128xf32>
    %cst_14 = arith.constant dense<0.000000e+00> : vector<8x128xf32>
    %37 = vector.multi_reduction <add>, %36, %cst_14 [0] : vector<2x8x128xf32> to vector<8x128xf32>
    %c0_15 = arith.constant 0 : index
    %c0_16 = arith.constant 0 : index
    %c0_17 = arith.constant 0 : index
    %38 = vector.load %arg4[%c0_15, %c0_16, %c0_17] : memref<1x8x128xf32, #tpu.memory_space<vmem>>, vector<1x8x128xf32>
    %39 = vector.shape_cast %37 : vector<8x128xf32> to vector<1x8x128xf32>
    %40 = arith.addf %38, %39 : vector<1x8x128xf32>
    %c0_18 = arith.constant 0 : index
    %c0_19 = arith.constant 0 : index
    %c0_20 = arith.constant 0 : index
    %41 = vector.load %arg4[%c0_18, %c0_19, %c0_20] : memref<1x8x128xf32, #tpu.memory_space<vmem>>, vector<1x8x128xf32>
    tpu.vector_store %arg4[%c0_18, %c0_19, %c0_20], %40 {strides = array<i32>} : memref<1x8x128xf32, #tpu.memory_space<vmem>>, vector<1x8x128xf32>,
    return
  }
  func.func @transform_0(%arg0: i32, %arg1: i32) -> (i32, i32) {
    %c1_i32 = arith.constant 1 : i32
    %0 = arith.muli %arg0, %c1_i32 : i32
    %1 = arith.addi %0, %arg1 : i32
    %c0_i32 = arith.constant 0 : i32
    %2 = arith.minsi %1, %c0_i32 : i32
    %c0_i32_0 = arith.constant 0 : i32
    %c0_i32_1 = arith.constant 0 : i32
    return %2, %c0_i32_0 : i32, i32
  }
  func.func @transform_1(%arg0: i32, %arg1: i32) -> (i32, i32) {
    %c1_i32 = arith.constant 1 : i32
    %0 = arith.muli %arg0, %c1_i32 : i32
    %1 = arith.addi %0, %arg1 : i32
    %c0_i32 = arith.constant 0 : i32
    %2 = arith.minsi %1, %c0_i32 : i32
    %c0_i32_0 = arith.constant 0 : i32
    %c0_i32_1 = arith.constant 0 : i32
    return %2, %c0_i32_0 : i32, i32
  }
  func.func @transform_2(%arg0: i32, %arg1: i32) -> (i32, i32, i32) {
    %c0_i32 = arith.constant 0 : i32
    %c0_i32_0 = arith.constant 0 : i32
    %c0_i32_1 = arith.constant 0 : i32
    return %arg0, %c0_i32, %c0_i32_0 : i32, i32, i32
  }
}

</mosaic_0001>

<bundles_post_ra>
// kernel: tpu_custom_call.1
= control target key start
LH: loop header
LB: loop body
LE: loop exit
PB: predicated region body
PF: predicated region fallthrough
CT: control target
= control target key end

     0   :  { %7 = vsyncpa [#allocation3], 0  ;;  %s396_s0 = inlined_call_operand.hbm [shape: f32[16,128], index: 0, kind: input, shape index: {}]   ;;  %s397_s1 = inlined_call_operand.hbm [shape: f32[16,128], index: 1, kind: input, shape index: {}]   ;;  %s398_s2 = inlined_call_operand.hbm [shape: f32[1,8,128], index: 2, kind: output, shape index: {}]  }
   0x1   :  { %8 = vsyncpa [#allocation6], 0 }
   0x2   :  { %9 = vsyncpa [#allocation4], 0  ;;  %s20_s11 = sshll.u32 %s396_s0, 4  ;;  %s284_s12 = smov [#allocation2]   ;;  %s21_s11 = int_to_ptr.hbm [resolvable:$true] %s20_s11 }
   0x3   :  { %s22_s13 = sshll.u32 %s284_s12, 4  ;;  %s39_s16 = sshll.u32 %s397_s1, 4  ;;  %s23_s13 = int_to_ptr.vmem [resolvable:$true] %s22_s13  ;;  %s40_s16 = int_to_ptr.hbm [resolvable:$true] %s39_s16 }
   0x4   :  { %s285_s17 = smov 128   ;;  %s286_s18 = smov 8  }
   0x5   :  { %28 = dma.hbm_to_vmem [thread:$0]  %s21_s11, 256, %s23_s13, [#allocation3], %s285_s17, %s285_s17, %s286_s18  }
   0x6   :  { %s287_s19 = smov [#allocation5]  }
   0x7   :  { %s41_s20 = sshll.u32 %s287_s19, 4  ;;  %s42_s20 = int_to_ptr.vmem [resolvable:$true] %s41_s20 }
   0x8   :  { %47 = dma.hbm_to_vmem [thread:$0]  %s40_s16, 256, %s42_s20, [#allocation6], %s285_s17, %s285_s17, %s286_s18  }
   0x9   :  { %278 = dma.done.wait [#allocation3], 256  }
   0xa   :  { %279 = vsyncadd [#allocation3], 4294967040 }
   0xb   :  { %280 = dma.done.wait [#allocation6], 256  }
   0xc   :  { %281 = vsyncadd [#allocation6], 4294967040  ;;  %v311_v0 = vld [vmem:[#allocation2] sm:$0xff]  ;;  %v313_v1 = vld [vmem:[#allocation2 + $0x8] sm:$0xff]  ;;  %vm288_vm9 = vmmov 1   ;;  %s289_s0 = smov [#allocation7]  }
   0xd   :  { %v73_v2 = vand.u32 2147483647, %v311_v0  ;;  %v74_v3 = vand.u32 2147483647, %v313_v1  ;;  %v324_v13 = vld [vmem:[#allocation5] sm:$0xff]  ;;  %v326_v14 = vld [vmem:[#allocation5 + $0x8] sm:$0xff] }
   0xe   :  { %vm111_vm0 = vcmp.ge.f32.partialorder %v311_v0, 0.0  ;;  %vm113_vm1 = vcmp.ge.f32.partialorder %v324_v13, 0.5  ;;  %v99_v18 = vsub.f32 0.0, %v311_v0  ;;  %vm112_vm2 = vcmp.ge.f32.partialorder %v313_v1, 0.0  ;;  %s170_s1 = sshll.u32 %s289_s0, 4  ;;  %s172_s23 = sshll.u32 %s398_s2, 4  ;;  %s171_s1 = int_to_ptr.vmem [resolvable:$true] %s170_s1  ;;  %s173_s23 = int_to_ptr.hbm [resolvable:$true] %s172_s23 }
   0xf   :  { %v75_v4 = vsub.f32 0.0, %v73_v2  ;;  %v76_v5 = vsub.f32 0.0, %v74_v3  ;;  %vm114_vm3 = vcmp.ge.f32.partialorder %v326_v14, 0.5  ;;  %v100_v21 = vsub.f32 0.0, %v313_v1  ;;  %vm339_vm4 = vmxor %vm111_vm0, %vm113_vm1 }
  0x10   :  { %v105_v22 = vsub.f32 1.0, %v324_v13  ;;  %v106_v23 = vsub.f32 1.0, %v326_v14  ;;  %vm346_vm6 = vmxor %vm112_vm2, %vm114_vm3  ;;  %v101_v47 = vmax.f32 %v99_v18, 0.0 }
  0x11   :  { %v77_v6 = vmul.f32 1.442695, %v75_v4  ;;  %v79_v7 = vmul.f32 1.442695, %v76_v5  ;;  %vm352_vm10 = vmxor %vm339_vm4, %vm288_vm9  ;;  %v102_v51 = vmax.f32 %v100_v21, 0.0 }
  0x12   :  { %vm363_vm13 = vmxor %vm346_vm6, %vm288_vm9  ;;  %v107_v63 = vmul.f32 %v105_v22, %v311_v0  ;;  %v108_v5 = vmul.f32 %v106_v23, %v313_v1 }
  0x13   :  { %194 = vpow2.f32 %v77_v6 }
  0x14   :  { %196 = vpow2.f32 %v79_v7 }
  0x19   :  { %v317_v8 = vpop.eup %194 }
  0x1a   :  { %v319_v9 = vpop.eup %196  ;;  %v81_v10 = vadd.f32 1.0, %v317_v8  ;;  %v84_v12 = vmul.f32 -0.5, %v317_v8  ;;  %v87_v20 = vand.u32 2147483647, %v317_v8  ;;  %v119_v55 = vsel %vm352_vm10, 1.0, %v317_v8 }
  0x1b   :  { %v90_v11 = vadd.f32 1.0, %v319_v9  ;;  %v93_v15 = vmul.f32 -0.5, %v319_v9  ;;  %v96_v26 = vand.u32 2147483647, %v319_v9  ;;  %v120_v58 = vsel %vm363_vm13, 1.0, %v319_v9 }
  0x1c   :  { %198 = vlog2.f32 %v81_v10  ;;  %v85_v16 = vadd.f32 1.0, %v84_v12  ;;  %vm128_vm5 = vweird.f32 %v81_v10  ;;  %v132_v32 = vand.u32 2147483647, %v81_v10 }
  0x1d   :  { %200 = vrcp.f32 %v81_v10  ;;  %v94_v25 = vadd.f32 1.0, %v93_v15  ;;  %v134_v33 = vand.u32 2147483648, %v81_v10  ;;  %vm143_vm8 = vweird.f32 %v90_v11 }
  0x1e   :  { %202 = vrcp.f32 %v90_v11  ;;  %v86_v30 = vmul.f32 %v317_v8, %v85_v16  ;;  %v149_v36 = vand.u32 2147483648, %v90_v11  ;;  %v147_v40 = vand.u32 2147483647, %v90_v11 }
  0x1f   :  { %204 = vlog2.f32 %v90_v11  ;;  %vm356_vm12 = vcmp.lt.f32.partialorder %v87_v20, 0.0004427343  ;;  %v95_v43 = vmul.f32 %v319_v9, %v94_v25  ;;  %vm367_vm14 = vcmp.lt.f32.partialorder %v96_v26, 0.0004427343 }
  0x20   :  { %v135_v49 = vor.u32 1.1754944e-38, %v134_v33  ;;  %vm133_vm0 = vcmp.eq.f32.partialorder %v132_v32, 8.507059e+37  ;;  %v150_v53 = vor.u32 1.1754944e-38, %v149_v36  ;;  %vm148_vm2 = vcmp.eq.f32.partialorder %v147_v40, 8.507059e+37 }
  0x22   :  { %v199_v17 = vpop.eup %198 }
  0x23   :  { %v201_v19 = vpop.eup %200  ;;  %v83_v37 = vmul.f32 0.6931472, %v199_v17 }
  0x24   :  { %v203_v24 = vpop.eup %202  ;;  %v124_v28 = vmul.f32 %v201_v19, %v81_v10  ;;  %vm129_vm7 = vweird.f32 %v201_v19 }
  0x25   :  { %v205_v29 = vpop.eup %204  ;;  %v139_v34 = vmul.f32 %v203_v24, %v90_v11  ;;  %vm144_vm11 = vweird.f32 %v203_v24  ;;  %vm373_vm15 = vmor %vm128_vm5, %vm129_vm7  ;;  %v89_v54 = vsel %vm356_vm12, %v86_v30, %v83_v37 }
  0x26   :  { %v125_v35 = vsub.f32 1.0, %v124_v28  ;;  %v92_v42 = vmul.f32 0.6931472, %v205_v29  ;;  %vm145_vm1 = vmor %vm143_vm8, %vm144_vm11  ;;  %v103_v62 = vadd.f32 %v101_v47, %v89_v54 }
  0x27   :  { %v140_v39 = vsub.f32 1.0, %v139_v34 }
  0x28   :  { %v126_v45 = vmul.f32 %v201_v19, %v125_v35  ;;  %v98_v57 = vsel %vm367_vm14, %v95_v43, %v92_v42  ;;  %v109_v10 = vadd.f32 %v107_v63, %v103_v62 }
  0x29   :  { %v141_v50 = vmul.f32 %v203_v24, %v140_v39  ;;  %v104_v4 = vadd.f32 %v102_v51, %v98_v57 }
  0x2a   :  { %v127_v52 = vadd.f32 %v201_v19, %v126_v45 }
  0x2b   :  { %v142_v56 = vadd.f32 %v203_v24, %v141_v50  ;;  %v110_v12 = vadd.f32 %v108_v5, %v104_v4 }
  0x2c   :  { %v131_v59 = vsel %vm373_vm15, %v201_v19, %v127_v52 }
  0x2d   :  { %v136_v60 = vsel %vm133_vm0, %v135_v49, %v131_v59  ;;  %v146_v61 = vsel %vm145_vm1, %v203_v24, %v142_v56 }
  0x2e   :  { %v137_v2 = vmul.f32 %v136_v60, %v119_v55  ;;  %v151_v3 = vsel %vm148_vm2, %v150_v53, %v146_v61 }
  0x2f   :  { %v152_v6 = vmul.f32 %v151_v3, %v120_v58 }
  0x30   :  { %v153_v7 = vsub.f32 1.0, %v137_v2 }
  0x31   :  { %v154_v8 = vsub.f32 1.0, %v152_v6 }
  0x32   :  { %v155_v11 = vmul.f32 %v153_v7, %v153_v7 }
  0x33   :  { %v156_v9 = vmul.f32 %v154_v8, %v154_v8 }
  0x34   :  { %v157_v13 = vmul.f32 0.25, %v155_v11 }
  0x35   :  { %v158_v14 = vmul.f32 0.25, %v156_v9 }
  0x36   :  { %v159_v15 = vmul.f32 %v157_v13, %v109_v10 }
  0x37   :  { %v160_v16 = vmul.f32 %v158_v14, %v110_v12 }
  0x39   :  { %v161_v0 = vadd.f32 %v160_v16, %v159_v15 }
  0x3b   :  { %164 = vst [vmem:[#allocation7] sm:$0xff] %v161_v0 }
  0x3c   :  { %175 = dma.vmem_to_hbm [thread:$0]  %s171_s1, 128, %s173_s23, [#allocation4]  }
  0x3d   :  { %282 = dma.done.wait [#allocation4], 128  }
  0x3e   :  { %283 = vsyncadd [#allocation4], 4294967168 }
  0x3f   :  { %180 = vsyncpa [#allocation3], 1 }
  0x40   :  { %181 = vsyncpa [#allocation6], 1 }
  0x41   :  { %182 = vsyncpa [#allocation4], 1 }

</bundles_post_ra>
